<compile_context>
chip_gen: v6e
topology: v6e:2x2x1
jax: 0.10.0
libtpu: 0.0.40
codegen_flags: <defaults>
</compile_context>

<pallas_src>
import functools

import jax
import jax.numpy as jnp
from jax import lax
from jax.experimental import pallas as pl
from jax.experimental.pallas import tpu as pltpu

PAD = 128  # lane width: pad every feature dim to this


# ----------------------------- Pallas kernel --------------------------------

def _autoencoder_kernel(labels_ref, w_ref, scale_ref, shift_ref, o_ref,
                        *, relu_flags):
    """Whole forward pass in one kernel.

    labels_ref : [B, 1]   int32   class labels (one-hot built in-kernel)
    w_ref      : [L, PAD, PAD] f32  pre-transposed, zero-padded layer weights
    scale_ref  : [L, 1, PAD]   f32  folded BN scale (0 in padded lanes)
    shift_ref  : [L, 1, PAD]   f32  folded bias+BN shift (0 in padded lanes)
    o_ref      : [B, PAD]      f32  padded output (real dims sliced outside)
    """
    batch = labels_ref.shape[0]
    # to_one_hot(labels) -> [B, PAD]; equivalent to gathering rows of W^T.
    col = lax.broadcasted_iota(jnp.int32, (batch, PAD), 1)
    x = (col == labels_ref[...]).astype(jnp.float32)

    # Static Python loop over layers: activation stays resident in vregs/VMEM.
    for l, apply_relu in enumerate(relu_flags):
        y = jnp.dot(x, w_ref[l], preferred_element_type=jnp.float32)  # MXU
        y = y * scale_ref[l] + shift_ref[l]                           # VPU
        if apply_relu:
            y = jnp.maximum(y, 0.0)
        x = y

    o_ref[...] = x


# --------------------------- parameter construction --------------------------

def _kaiming_uniform_relu(key, out_dim, in_dim):
    # torch.nn.init.kaiming_uniform_(w, nonlinearity='relu'):
    #   gain = sqrt(2), bound = gain * sqrt(3 / fan_in) = sqrt(6 / fan_in)
    bound = jnp.sqrt(6.0 / in_dim)
    return jax.random.uniform(key, (out_dim, in_dim), jnp.float32, -bound, bound)


def _make_layer(key, in_dim, out_dim, batch_norm):
    """Build one padded layer: Wt [PAD, PAD], scale/shift [1, PAD]."""
    w = _kaiming_uniform_relu(key, out_dim, in_dim)      # [out, in] (torch layout)
    wt = jnp.transpose(w)                                # [in, out] for x @ Wt
    b = jnp.zeros((out_dim,), jnp.float32)               # init.zeros_(bias)

    eps = 1e-5
    if batch_norm:
        # fresh BN params/stats: gamma=1, beta=0, running_mean=0, running_var=1
        gamma = jnp.ones((out_dim,), jnp.float32)
        beta = jnp.zeros((out_dim,), jnp.float32)
        mean = jnp.zeros((out_dim,), jnp.float32)
        var = jnp.ones((out_dim,), jnp.float32)
        scale = gamma / jnp.sqrt(var + eps)
        shift = beta - mean * scale
    else:
        scale = jnp.ones((out_dim,), jnp.float32)
        shift = jnp.zeros((out_dim,), jnp.float32)

    # Fold Linear bias into the shift:  (x@Wt + b)*scale + shift
    #                                 = (x@Wt)*scale + (b*scale + shift)
    shift = b * scale + shift

    # Zero-pad to [PAD, PAD] / [1, PAD]; padded-lane scale/shift = 0 so the
    # padded output lanes are exactly 0 and stay 0 through ReLU / next layers.
    wt_p = jnp.zeros((PAD, PAD), jnp.float32).at[:in_dim, :out_dim].set(wt)
    scale_p = jnp.zeros((1, PAD), jnp.float32).at[0, :out_dim].set(scale)
    shift_p = jnp.zeros((1, PAD), jnp.float32).at[0, :out_dim].set(shift)
    return wt_p, scale_p, shift_p


def init_autoencoder_params(key, input_dim, hidden_dim, hidden_layers, latent_dim):
    assert max(input_dim, hidden_dim, latent_dim) <= PAD
    # (in_dim, out_dim, batch_norm, relu) per layer, in execution order.
    layer_defs = []
    layer_defs.append((input_dim, hidden_dim, True, True))      # encoder_initial
    layer_defs += [(hidden_dim, hidden_dim, True, True)] * hidden_layers   # encoder_stack
    layer_defs.append((hidden_dim, latent_dim, False, False))   # encoder_latent
    layer_defs.append((latent_dim, hidden_dim, True, True))     # decoder_latent
    layer_defs += [(hidden_dim, hidden_dim, True, True)] * hidden_layers   # decoder_stack
    layer_defs.append((hidden_dim, input_dim, False, False))    # decoder_final

    keys = jax.random.split(key, len(layer_defs))
    ws, scales, shifts, relu_flags = [], [], [], []
    for k, (din, dout, bn, relu) in zip(keys, layer_defs):
        wt_p, sc_p, sh_p = _make_layer(k, din, dout, bn)
        ws.append(wt_p); scales.append(sc_p); shifts.append(sh_p)
        relu_flags.append(relu)

    params = {
        "w": jnp.stack(ws, axis=0),          # [L, PAD, PAD]
        "scale": jnp.stack(scales, axis=0),  # [L, 1, PAD]
        "shift": jnp.stack(shifts, axis=0),  # [L, 1, PAD]
    }
    return params, tuple(relu_flags)


# -------------------------------- forward -----------------------------------

def autoencoder_forward(params, relu_flags, x_labels, input_dim):
    batch = x_labels.shape[0]
    labels = x_labels.reshape(batch, 1).astype(jnp.int32)

    kernel = functools.partial(_autoencoder_kernel, relu_flags=relu_flags)
    vmem = pl.BlockSpec(memory_space=pltpu.MemorySpace.VMEM)

    out_padded = pl.pallas_call(
        kernel,
        out_shape=jax.ShapeDtypeStruct((batch, PAD), jnp.float32),
        in_specs=[vmem, vmem, vmem, vmem],
        out_specs=vmem,
    )(labels, params["w"], params["scale"], params["shift"])

    # Strip the lane padding back to the real output width.
    return out_padded[:, :input_dim]


# --------------------------------- main --------------------------------------

if __name__ == "__main__":
    INPUT_DIM = 16
    HIDDEN_DIM = 32
    HIDDEN_LAYERS = 2
    LATENT_DIM = 8
    BATCH = 8

    key = jax.random.PRNGKey(0)
    k_param, k_data = jax.random.split(key)

    params, relu_flags = init_autoencoder_params(
        k_param, INPUT_DIM, HIDDEN_DIM, HIDDEN_LAYERS, LATENT_DIM)

    # integer class labels in [0, INPUT_DIM) -> one-hot inside the kernel
    x_labels = jax.random.randint(k_data, (BATCH,), 0, INPUT_DIM, dtype=jnp.int32)

    out = autoencoder_forward(params, relu_flags, x_labels, INPUT_DIM)
    out = jax.block_until_ready(out)

    assert out.shape == (BATCH, INPUT_DIM), out.shape
    assert out.dtype == jnp.float32, out.dtype
    assert bool(jnp.all(jnp.isfinite(out)))
    print("KERNEL_OK")
</pallas_src>

<mosaic_0001>
module attributes {stable_mosaic.version = 11 : i64} {
  func.func @_autoencoder_kernel(%arg0: memref<8x1xi32, #tpu.memory_space<vmem>>, %arg1: memref<8x128x128xf32, #tpu.memory_space<vmem>>, %arg2: memref<8x1x128xf32, #tpu.memory_space<vmem>>, %arg3: memref<8x1x128xf32, #tpu.memory_space<vmem>>, %arg4: memref<8x128xf32, #tpu.memory_space<vmem>>) attributes {dimension_semantics = [], scalar_prefetch = 0 : i64, scratch_operands = 0 : i64, tpu.core_type = #tpu.core_type<tc>} {
    %0 = tpu.iota {dimensions = array<i32: 1>} : vector<8x128xi32>
    %c0 = arith.constant 0 : index
    %c0_0 = arith.constant 0 : index
    %1 = vector.load %arg0[%c0, %c0_0] : memref<8x1xi32, #tpu.memory_space<vmem>>, vector<8x1xi32>
    %2 = vector.broadcast %1 : vector<8x1xi32> to vector<8x128xi32>
    %3 = arith.cmpi eq, %0, %2 : vector<8x128xi32>
    %4 = arith.extui %3 : vector<8x128xi1> to vector<8x128xi32>
    %5 = arith.sitofp %4 : vector<8x128xi32> to vector<8x128xf32>
    %c0_1 = arith.constant 0 : index
    %c0_2 = arith.constant 0 : index
    %c0_3 = arith.constant 0 : index
    %6 = vector.load %arg1[%c0_1, %c0_2, %c0_3] : memref<8x128x128xf32, #tpu.memory_space<vmem>>, vector<1x128x128xf32>
    %7 = vector.shape_cast %6 : vector<1x128x128xf32> to vector<128x128xf32>
    %cst = arith.constant dense<0.000000e+00> : vector<8x128xf32>
    %8 = tpu.matmul %5, %7, %cst {dimension_numbers = #tpu.dot_dimension_numbers<[1], [0], [0], [1], [0, 0, 1, 1], [], []>} : vector<8x128xf32>, vector<128x128xf32>, vector<8x128xf32> -> vector<8x128xf32>
    %c0_4 = arith.constant 0 : index
    %c0_5 = arith.constant 0 : index
    %c0_6 = arith.constant 0 : index
    %9 = vector.load %arg2[%c0_4, %c0_5, %c0_6] : memref<8x1x128xf32, #tpu.memory_space<vmem>>, vector<1x1x128xf32>
    %10 = vector.shape_cast %9 : vector<1x1x128xf32> to vector<1x128xf32>
    %11 = vector.broadcast %10 : vector<1x128xf32> to vector<8x128xf32>
    %12 = arith.mulf %8, %11 : vector<8x128xf32>
    %c0_7 = arith.constant 0 : index
    %c0_8 = arith.constant 0 : index
    %c0_9 = arith.constant 0 : index
    %13 = vector.load %arg3[%c0_7, %c0_8, %c0_9] : memref<8x1x128xf32, #tpu.memory_space<vmem>>, vector<1x1x128xf32>
    %14 = vector.shape_cast %13 : vector<1x1x128xf32> to vector<1x128xf32>
    %15 = vector.broadcast %14 : vector<1x128xf32> to vector<8x128xf32>
    %16 = arith.addf %12, %15 : vector<8x128xf32>
    %cst_10 = arith.constant 0.000000e+00 : f32
    %17 = vector.broadcast %cst_10 : f32 to vector<8x128xf32>
    %18 = arith.maximumf %16, %17 : vector<8x128xf32>
    %c1 = arith.constant 1 : index
    %c0_11 = arith.constant 0 : index
    %c0_12 = arith.constant 0 : index
    %19 = vector.load %arg1[%c1, %c0_11, %c0_12] : memref<8x128x128xf32, #tpu.memory_space<vmem>>, vector<1x128x128xf32>
    %20 = vector.shape_cast %19 : vector<1x128x128xf32> to vector<128x128xf32>
    %cst_13 = arith.constant dense<0.000000e+00> : vector<8x128xf32>
    %21 = tpu.matmul %18, %20, %cst_13 {dimension_numbers = #tpu.dot_dimension_numbers<[1], [0], [0], [1], [0, 0, 1, 1], [], []>} : vector<8x128xf32>, vector<128x128xf32>, vector<8x128xf32> -> vector<8x128xf32>
    %c1_14 = arith.constant 1 : index
    %c0_15 = arith.constant 0 : index
    %c0_16 = arith.constant 0 : index
    %22 = vector.load %arg2[%c1_14, %c0_15, %c0_16] : memref<8x1x128xf32, #tpu.memory_space<vmem>>, vector<1x1x128xf32>
    %23 = vector.shape_cast %22 : vector<1x1x128xf32> to vector<1x128xf32>
    %24 = vector.broadcast %23 : vector<1x128xf32> to vector<8x128xf32>
    %25 = arith.mulf %21, %24 : vector<8x128xf32>
    %c1_17 = arith.constant 1 : index
    %c0_18 = arith.constant 0 : index
    %c0_19 = arith.constant 0 : index
    %26 = vector.load %arg3[%c1_17, %c0_18, %c0_19] : memref<8x1x128xf32, #tpu.memory_space<vmem>>, vector<1x1x128xf32>
    %27 = vector.shape_cast %26 : vector<1x1x128xf32> to vector<1x128xf32>
    %28 = vector.broadcast %27 : vector<1x128xf32> to vector<8x128xf32>
    %29 = arith.addf %25, %28 : vector<8x128xf32>
    %cst_20 = arith.constant 0.000000e+00 : f32
    %30 = vector.broadcast %cst_20 : f32 to vector<8x128xf32>
    %31 = arith.maximumf %29, %30 : vector<8x128xf32>
    %c2 = arith.constant 2 : index
    %c0_21 = arith.constant 0 : index
    %c0_22 = arith.constant 0 : index
    %32 = vector.load %arg1[%c2, %c0_21, %c0_22] : memref<8x128x128xf32, #tpu.memory_space<vmem>>, vector<1x128x128xf32>
    %33 = vector.shape_cast %32 : vector<1x128x128xf32> to vector<128x128xf32>
    %cst_23 = arith.constant dense<0.000000e+00> : vector<8x128xf32>
    %34 = tpu.matmul %31, %33, %cst_23 {dimension_numbers = #tpu.dot_dimension_numbers<[1], [0], [0], [1], [0, 0, 1, 1], [], []>} : vector<8x128xf32>, vector<128x128xf32>, vector<8x128xf32> -> vector<8x128xf32>
    %c2_24 = arith.constant 2 : index
    %c0_25 = arith.constant 0 : index
    %c0_26 = arith.constant 0 : index
    %35 = vector.load %arg2[%c2_24, %c0_25, %c0_26] : memref<8x1x128xf32, #tpu.memory_space<vmem>>, vector<1x1x128xf32>
    %36 = vector.shape_cast %35 : vector<1x1x128xf32> to vector<1x128xf32>
    %37 = vector.broadcast %36 : vector<1x128xf32> to vector<8x128xf32>
    %38 = arith.mulf %34, %37 : vector<8x128xf32>
    %c2_27 = arith.constant 2 : index
    %c0_28 = arith.constant 0 : index
    %c0_29 = arith.constant 0 : index
    %39 = vector.load %arg3[%c2_27, %c0_28, %c0_29] : memref<8x1x128xf32, #tpu.memory_space<vmem>>, vector<1x1x128xf32>
    %40 = vector.shape_cast %39 : vector<1x1x128xf32> to vector<1x128xf32>
    %41 = vector.broadcast %40 : vector<1x128xf32> to vector<8x128xf32>
    %42 = arith.addf %38, %41 : vector<8x128xf32>
    %cst_30 = arith.constant 0.000000e+00 : f32
    %43 = vector.broadcast %cst_30 : f32 to vector<8x128xf32>
    %44 = arith.maximumf %42, %43 : vector<8x128xf32>
    %c3 = arith.constant 3 : index
    %c0_31 = arith.constant 0 : index
    %c0_32 = arith.constant 0 : index
    %45 = vector.load %arg1[%c3, %c0_31, %c0_32] : memref<8x128x128xf32, #tpu.memory_space<vmem>>, vector<1x128x128xf32>
    %46 = vector.shape_cast %45 : vector<1x128x128xf32> to vector<128x128xf32>
    %cst_33 = arith.constant dense<0.000000e+00> : vector<8x128xf32>
    %47 = tpu.matmul %44, %46, %cst_33 {dimension_numbers = #tpu.dot_dimension_numbers<[1], [0], [0], [1], [0, 0, 1, 1], [], []>} : vector<8x128xf32>, vector<128x128xf32>, vector<8x128xf32> -> vector<8x128xf32>
    %c3_34 = arith.constant 3 : index
    %c0_35 = arith.constant 0 : index
    %c0_36 = arith.constant 0 : index
    %48 = vector.load %arg2[%c3_34, %c0_35, %c0_36] : memref<8x1x128xf32, #tpu.memory_space<vmem>>, vector<1x1x128xf32>
    %49 = vector.shape_cast %48 : vector<1x1x128xf32> to vector<1x128xf32>
    %50 = vector.broadcast %49 : vector<1x128xf32> to vector<8x128xf32>
    %51 = arith.mulf %47, %50 : vector<8x128xf32>
    %c3_37 = arith.constant 3 : index
    %c0_38 = arith.constant 0 : index
    %c0_39 = arith.constant 0 : index
    %52 = vector.load %arg3[%c3_37, %c0_38, %c0_39] : memref<8x1x128xf32, #tpu.memory_space<vmem>>, vector<1x1x128xf32>
    %53 = vector.shape_cast %52 : vector<1x1x128xf32> to vector<1x128xf32>
    %54 = vector.broadcast %53 : vector<1x128xf32> to vector<8x128xf32>
    %55 = arith.addf %51, %54 : vector<8x128xf32>
    %c4 = arith.constant 4 : index
    %c0_40 = arith.constant 0 : index
    %c0_41 = arith.constant 0 : index
    %56 = vector.load %arg1[%c4, %c0_40, %c0_41] : memref<8x128x128xf32, #tpu.memory_space<vmem>>, vector<1x128x128xf32>
    %57 = vector.shape_cast %56 : vector<1x128x128xf32> to vector<128x128xf32>
    %cst_42 = arith.constant dense<0.000000e+00> : vector<8x128xf32>
    %58 = tpu.matmul %55, %57, %cst_42 {dimension_numbers = #tpu.dot_dimension_numbers<[1], [0], [0], [1], [0, 0, 1, 1], [], []>} : vector<8x128xf32>, vector<128x128xf32>, vector<8x128xf32> -> vector<8x128xf32>
    %c4_43 = arith.constant 4 : index
    %c0_44 = arith.constant 0 : index
    %c0_45 = arith.constant 0 : index
    %59 = vector.load %arg2[%c4_43, %c0_44, %c0_45] : memref<8x1x128xf32, #tpu.memory_space<vmem>>, vector<1x1x128xf32>
    %60 = vector.shape_cast %59 : vector<1x1x128xf32> to vector<1x128xf32>
    %61 = vector.broadcast %60 : vector<1x128xf32> to vector<8x128xf32>
    %62 = arith.mulf %58, %61 : vector<8x128xf32>
    %c4_46 = arith.constant 4 : index
    %c0_47 = arith.constant 0 : index
    %c0_48 = arith.constant 0 : index
    %63 = vector.load %arg3[%c4_46, %c0_47, %c0_48] : memref<8x1x128xf32, #tpu.memory_space<vmem>>, vector<1x1x128xf32>
    %64 = vector.shape_cast %63 : vector<1x1x128xf32> to vector<1x128xf32>
    %65 = vector.broadcast %64 : vector<1x128xf32> to vector<8x128xf32>
    %66 = arith.addf %62, %65 : vector<8x128xf32>
    %cst_49 = arith.constant 0.000000e+00 : f32
    %67 = vector.broadcast %cst_49 : f32 to vector<8x128xf32>
    %68 = arith.maximumf %66, %67 : vector<8x128xf32>
    %c5 = arith.constant 5 : index
    %c0_50 = arith.constant 0 : index
    %c0_51 = arith.constant 0 : index
    %69 = vector.load %arg1[%c5, %c0_50, %c0_51] : memref<8x128x128xf32, #tpu.memory_space<vmem>>, vector<1x128x128xf32>
    %70 = vector.shape_cast %69 : vector<1x128x128xf32> to vector<128x128xf32>
    %cst_52 = arith.constant dense<0.000000e+00> : vector<8x128xf32>
    %71 = tpu.matmul %68, %70, %cst_52 {dimension_numbers = #tpu.dot_dimension_numbers<[1], [0], [0], [1], [0, 0, 1, 1], [], []>} : vector<8x128xf32>, vector<128x128xf32>, vector<8x128xf32> -> vector<8x128xf32>
    %c5_53 = arith.constant 5 : index
    %c0_54 = arith.constant 0 : index
    %c0_55 = arith.constant 0 : index
    %72 = vector.load %arg2[%c5_53, %c0_54, %c0_55] : memref<8x1x128xf32, #tpu.memory_space<vmem>>, vector<1x1x128xf32>
    %73 = vector.shape_cast %72 : vector<1x1x128xf32> to vector<1x128xf32>
    %74 = vector.broadcast %73 : vector<1x128xf32> to vector<8x128xf32>
    %75 = arith.mulf %71, %74 : vector<8x128xf32>
    %c5_56 = arith.constant 5 : index
    %c0_57 = arith.constant 0 : index
    %c0_58 = arith.constant 0 : index
    %76 = vector.load %arg3[%c5_56, %c0_57, %c0_58] : memref<8x1x128xf32, #tpu.memory_space<vmem>>, vector<1x1x128xf32>
    %77 = vector.shape_cast %76 : vector<1x1x128xf32> to vector<1x128xf32>
    %78 = vector.broadcast %77 : vector<1x128xf32> to vector<8x128xf32>
    %79 = arith.addf %75, %78 : vector<8x128xf32>
    %cst_59 = arith.constant 0.000000e+00 : f32
    %80 = vector.broadcast %cst_59 : f32 to vector<8x128xf32>
    %81 = arith.maximumf %79, %80 : vector<8x128xf32>
    %c6 = arith.constant 6 : index
    %c0_60 = arith.constant 0 : index
    %c0_61 = arith.constant 0 : index
    %82 = vector.load %arg1[%c6, %c0_60, %c0_61] : memref<8x128x128xf32, #tpu.memory_space<vmem>>, vector<1x128x128xf32>
    %83 = vector.shape_cast %82 : vector<1x128x128xf32> to vector<128x128xf32>
    %cst_62 = arith.constant dense<0.000000e+00> : vector<8x128xf32>
    %84 = tpu.matmul %81, %83, %cst_62 {dimension_numbers = #tpu.dot_dimension_numbers<[1], [0], [0], [1], [0, 0, 1, 1], [], []>} : vector<8x128xf32>, vector<128x128xf32>, vector<8x128xf32> -> vector<8x128xf32>
    %c6_63 = arith.constant 6 : index
    %c0_64 = arith.constant 0 : index
    %c0_65 = arith.constant 0 : index
    %85 = vector.load %arg2[%c6_63, %c0_64, %c0_65] : memref<8x1x128xf32, #tpu.memory_space<vmem>>, vector<1x1x128xf32>
    %86 = vector.shape_cast %85 : vector<1x1x128xf32> to vector<1x128xf32>
    %87 = vector.broadcast %86 : vector<1x128xf32> to vector<8x128xf32>
    %88 = arith.mulf %84, %87 : vector<8x128xf32>
    %c6_66 = arith.constant 6 : index
    %c0_67 = arith.constant 0 : index
    %c0_68 = arith.constant 0 : index
    %89 = vector.load %arg3[%c6_66, %c0_67, %c0_68] : memref<8x1x128xf32, #tpu.memory_space<vmem>>, vector<1x1x128xf32>
    %90 = vector.shape_cast %89 : vector<1x1x128xf32> to vector<1x128xf32>
    %91 = vector.broadcast %90 : vector<1x128xf32> to vector<8x128xf32>
    %92 = arith.addf %88, %91 : vector<8x128xf32>
    %cst_69 = arith.constant 0.000000e+00 : f32
    %93 = vector.broadcast %cst_69 : f32 to vector<8x128xf32>
    %94 = arith.maximumf %92, %93 : vector<8x128xf32>
    %c7 = arith.constant 7 : index
    %c0_70 = arith.constant 0 : index
    %c0_71 = arith.constant 0 : index
    %95 = vector.load %arg1[%c7, %c0_70, %c0_71] : memref<8x128x128xf32, #tpu.memory_space<vmem>>, vector<1x128x128xf32>
    %96 = vector.shape_cast %95 : vector<1x128x128xf32> to vector<128x128xf32>
    %cst_72 = arith.constant dense<0.000000e+00> : vector<8x128xf32>
    %97 = tpu.matmul %94, %96, %cst_72 {dimension_numbers = #tpu.dot_dimension_numbers<[1], [0], [0], [1], [0, 0, 1, 1], [], []>} : vector<8x128xf32>, vector<128x128xf32>, vector<8x128xf32> -> vector<8x128xf32>
    %c7_73 = arith.constant 7 : index
    %c0_74 = arith.constant 0 : index
    %c0_75 = arith.constant 0 : index
    %98 = vector.load %arg2[%c7_73, %c0_74, %c0_75] : memref<8x1x128xf32, #tpu.memory_space<vmem>>, vector<1x1x128xf32>
    %99 = vector.shape_cast %98 : vector<1x1x128xf32> to vector<1x128xf32>
    %100 = vector.broadcast %99 : vector<1x128xf32> to vector<8x128xf32>
    %101 = arith.mulf %97, %100 : vector<8x128xf32>
    %c7_76 = arith.constant 7 : index
    %c0_77 = arith.constant 0 : index
    %c0_78 = arith.constant 0 : index
    %102 = vector.load %arg3[%c7_76, %c0_77, %c0_78] : memref<8x1x128xf32, #tpu.memory_space<vmem>>, vector<1x1x128xf32>
    %103 = vector.shape_cast %102 : vector<1x1x128xf32> to vector<1x128xf32>
    %104 = vector.broadcast %103 : vector<1x128xf32> to vector<8x128xf32>
    %105 = arith.addf %101, %104 : vector<8x128xf32>
    %c0_79 = arith.constant 0 : index
    %c0_80 = arith.constant 0 : index
    %106 = vector.load %arg4[%c0_79, %c0_80] : memref<8x128xf32, #tpu.memory_space<vmem>>, vector<8x128xf32>
    tpu.vector_store %arg4[%c0_79, %c0_80], %105 {strides = array<i32>} : memref<8x128xf32, #tpu.memory_space<vmem>>, vector<8x128xf32>,
    return
  }
}

</mosaic_0001>

<bundles_post_ra>
// kernel: tpu_custom_call.1
= control target key start
LH: loop header
LB: loop body
LE: loop exit
PB: predicated region body
PF: predicated region fallthrough
CT: control target
= control target key end

     0   :  { %9 = vsyncpa [#allocation3], 0  ;;  %s1650_s0 = inlined_call_operand.vmem [shape: s32[8,1], index: 0, kind: input, shape index: {}]   ;;  %s1651_s1 = inlined_call_operand.hbm [shape: f32[8,128,128], index: 1, kind: input, shape index: {}]   ;;  %s1652_s2 = inlined_call_operand.vmem [shape: f32[8,1,128], index: 2, kind: input, shape index: {}]   ;;  %s1653_s3 = inlined_call_operand.hbm [shape: f32[8,1,128], index: 3, kind: input, shape index: {}]   ;;  %s1654_s4 = inlined_call_operand.hbm [shape: f32[8,128], index: 4, kind: output, shape index: {}]  }
   0x1   :  { %10 = vsyncpa [#allocation6], 0 }
   0x2   :  { %11 = vsyncpa [#allocation4], 0  ;;  %s1434_s15 = smov [#allocation2]  }
   0x3   :  { %s19_s16 = sshll.u32 %s1434_s15, 4  ;;  %s20_s16 = int_to_ptr.vmem [resolvable:$true] %s19_s16 }
   0x4   :  { %s1376_s17 = scalar_lea.vmem %s20_s16, 16384  ;;  %p1381_p1 = scmp.lt.s32.totalorder %s20_s16, %s20_s16 }
   0x5   :  { %p1377_p0 = scmp.ne.s32.totalorder %s20_s16, %s1376_s17  ;;  %p1382_p2 = scmp.lt.s32.totalorder %s1376_s17, %s1376_s17 }
   0x7   :  { %p1383_p3 = por %p1382_p2, %p1381_p1 }
   0x9   :  { %p1384_p4 = pnand %p1383_p3, %p1377_p0 }
   0xb   :  { %1387 = shalt.err (!%p1384_p4)
}
   0xc   :  { %s1435_s18 = smov 128   ;;  %s1436_s19 = smov 8  }
   0xd   :  { %25 = dma.hbm_to_vmem [thread:$0]  %s1651_s1, 16384, %s20_s16, [#allocation3], %s1435_s18, %s1435_s18, %s1436_s19  }
   0xe   :  { %s1437_s22 = smov [#allocation5]  }
   0xf   :  { %s33_s23 = sshll.u32 %s1437_s22, 4  ;;  %s34_s23 = int_to_ptr.vmem [resolvable:$true] %s33_s23 }
  0x10   :  { %s1396_s24 = scalar_lea.vmem %s34_s23, 128  ;;  %p1401_p6 = scmp.lt.s32.totalorder %s34_s23, %s34_s23 }
  0x11   :  { %p1397_p5 = scmp.ne.s32.totalorder %s34_s23, %s1396_s24  ;;  %p1402_p7 = scmp.lt.s32.totalorder %s1396_s24, %s1396_s24 }
  0x13   :  { %p1403_p8 = por %p1402_p7, %p1401_p6 }
  0x15   :  { %p1404_p9 = pnand %p1403_p8, %p1397_p5 }
  0x17   :  { %1407 = shalt.err (!%p1404_p9)
}
  0x18   :  { %s1438_s25 = smov 16   ;;  %s1439_s26 = smov 1  }
  0x19   :  { %39 = dma.hbm_to_vmem [thread:$0]  %s1653_s3, 128, %s34_s23, [#allocation6], %s1438_s25, %s1438_s25, %s1439_s26  }
  0x1a   :  { %1428 = dma.done.wait [#allocation3], 16384  }
  0x1b   :  { %1429 = vsyncadd [#allocation3], 4294950912 }
  0x1c   :  { %1430 = dma.done.wait [#allocation6], 128  }
  0x1d   :  { %1431 = vsyncadd [#allocation6], 4294967168  ;;  %v1440_v0 = vmov 0   ;;  %v1441_v1 = vmov 0.0   ;;  %vm1442_vm0 = vmmov 0   ;;  %v48_v2 = vld [vmem:[%s1650_s0] sm:$0xff]  ;;  %v46_v31 = vlaneseq }
  0x1e   :  { %1367 = vset.pattern.permute.xlu0 %v1440_v0  ;;  %1076 = vmatprep.subr.mxu0 %v1441_v1  ;;  %v70_v3 = vld [vmem:[#allocation2 + $0x78] sm:$0xff]  ;;  %v69_v4 = vld [vmem:[#allocation2 + $0x70] sm:$0xff]  ;;  %v68_v5 = vld [vmem:[#allocation2 + $0x68] sm:$0xff]  ;;  %v1443_v34 = vmov 1.0   ;;  %s1444_s18 = smov [#allocation7]  }
  0x1f   :  { %1111 = vmatprep.subr.mxu1 %v1441_v1  ;;  %1108 = vmatprep.mubr.msk.f32.mxu0 %vm1442_vm0, %v1441_v1  ;;  %v67_v6 = vld [vmem:[#allocation2 + $0x60] sm:$0xff]  ;;  %v174_v7 = vld [vmem:[#allocation2 + $0xf8] sm:$0xff]  ;;  %v173_v9 = vld [vmem:[#allocation2 + $0xf0] sm:$0xff]  ;;  %v47_v32 = vand.u32 127, %v46_v31  ;;  %s905_s19 = sshll.u32 %s1444_s18, 4  ;;  %s906_s19 = int_to_ptr.vmem [resolvable:$true] %s905_s19 }
  0x20   :  { %1143 = vmatprep.mubr.msk.f32.mxu1 %vm1442_vm0, %v1441_v1  ;;  %50 = vperm.xlu0 %1367, %v48_v2   ;;  %v66_v8 = vld [vmem:[#allocation2 + $0x58] sm:$0xff]  ;;  %v172_v10 = vld [vmem:[#allocation2 + $0xe8] sm:$0xff]  ;;  %v65_v11 = vld [vmem:[#allocation2 + $0x50] sm:$0xff]  ;;  %s1408_s20 = scalar_lea.vmem %s906_s19, 128  ;;  %p1413_p11 = scmp.lt.s32.totalorder %s906_s19, %s906_s19 }
  0x21   :  { %1077 = vmatpush3.msra.mxu0 %v70_v3  ;;  %1112 = vmatpush3.msra.mxu1 %v174_v7  ;;  %v171_v12 = vld [vmem:[#allocation2 + $0xe0] sm:$0xff]  ;;  %v64_v13 = vld [vmem:[#allocation2 + $0x48] sm:$0xff]  ;;  %v170_v14 = vld [vmem:[#allocation2 + $0xd8] sm:$0xff]  ;;  %p1409_p10 = scmp.ne.s32.totalorder %s906_s19, %s1408_s20  ;;  %p1414_p12 = scmp.lt.s32.totalorder %s1408_s20, %s1408_s20 }
  0x22   :  { %1078 = vmatprep.subr.mxu0 %v1441_v1  ;;  %1113 = vmatprep.subr.mxu1 %v1441_v1  ;;  %v63_v15 = vld [vmem:[#allocation2 + $0x40] sm:$0xff]  ;;  %v169_v16 = vld [vmem:[#allocation2 + $0xd0] sm:$0xff]  ;;  %v62_v17 = vld [vmem:[#allocation2 + $0x38] sm:$0xff] }
  0x23   :  { %1079 = vmatpush3.msra.mxu0 %v69_v4  ;;  %1114 = vmatpush3.msra.mxu1 %v173_v9  ;;  %v168_v18 = vld [vmem:[#allocation2 + $0xc8] sm:$0xff]  ;;  %v61_v19 = vld [vmem:[#allocation2 + $0x30] sm:$0xff]  ;;  %v167_v20 = vld [vmem:[#allocation2 + $0xc0] sm:$0xff]  ;;  %p1415_p13 = por %p1414_p12, %p1413_p11 }
  0x24   :  { %1080 = vmatprep.subr.mxu0 %v1441_v1  ;;  %1115 = vmatprep.subr.mxu1 %v1441_v1  ;;  %v60_v21 = vld [vmem:[#allocation2 + $0x28] sm:$0xff]  ;;  %v166_v22 = vld [vmem:[#allocation2 + $0xb8] sm:$0xff]  ;;  %v59_v23 = vld [vmem:[#allocation2 + $0x20] sm:$0xff] }
  0x25   :  { %1081 = vmatpush3.msra.mxu0 %v68_v5  ;;  %1116 = vmatpush3.msra.mxu1 %v172_v10  ;;  %v165_v24 = vld [vmem:[#allocation2 + $0xb0] sm:$0xff]  ;;  %v58_v25 = vld [vmem:[#allocation2 + $0x18] sm:$0xff]  ;;  %v164_v26 = vld [vmem:[#allocation2 + $0xa8] sm:$0xff]  ;;  %p1416_p0 = pnand %p1415_p13, %p1409_p10 }
  0x26   :  { %1082 = vmatprep.subr.mxu0 %v1441_v1  ;;  %1117 = vmatprep.subr.mxu1 %v1441_v1  ;;  %v57_v27 = vld [vmem:[#allocation2 + $0x10] sm:$0xff]  ;;  %v163_v28 = vld [vmem:[#allocation2 + $0xa0] sm:$0xff]  ;;  %v56_v29 = vld [vmem:[#allocation2 + $0x8] sm:$0xff] }
  0x27   :  { %1083 = vmatpush3.msra.mxu0 %v67_v6  ;;  %1118 = vmatpush3.msra.mxu1 %v171_v12  ;;  %v55_v30 = vld [vmem:[#allocation2] sm:$0xff]  ;;  %v162_v35 = vld [vmem:[#allocation2 + $0x98] sm:$0xff]  ;;  %v161_v36 = vld [vmem:[#allocation2 + $0x90] sm:$0xff] }
  0x28   :  { %1084 = vmatprep.subr.mxu0 %v1441_v1  ;;  %1119 = vmatprep.subr.mxu1 %v1441_v1  ;;  %v160_v37 = vld [vmem:[#allocation2 + $0x88] sm:$0xff]  ;;  %v159_v38 = vld [vmem:[#allocation2 + $0x80] sm:$0xff]  ;;  %v280_v39 = vld [vmem:[#allocation2 + $0x178] sm:$0xff] }
  0x29   :  { %1085 = vmatpush3.msra.mxu0 %v66_v8  ;;  %1120 = vmatpush3.msra.mxu1 %v170_v14  ;;  %v279_v40 = vld [vmem:[#allocation2 + $0x170] sm:$0xff]  ;;  %v278_v41 = vld [vmem:[#allocation2 + $0x168] sm:$0xff]  ;;  %v277_v42 = vld [vmem:[#allocation2 + $0x160] sm:$0xff] }
  0x2a   :  { %1086 = vmatprep.subr.mxu0 %v1441_v1  ;;  %1121 = vmatprep.subr.mxu1 %v1441_v1  ;;  %v276_v43 = vld [vmem:[#allocation2 + $0x158] sm:$0xff]  ;;  %v275_v44 = vld [vmem:[#allocation2 + $0x150] sm:$0xff]  ;;  %v274_v45 = vld [vmem:[#allocation2 + $0x148] sm:$0xff] }
  0x2b   :  { %1087 = vmatpush3.msra.mxu0 %v65_v11  ;;  %1122 = vmatpush3.msra.mxu1 %v169_v16  ;;  %v273_v46 = vld [vmem:[#allocation2 + $0x140] sm:$0xff]  ;;  %v272_v47 = vld [vmem:[#allocation2 + $0x138] sm:$0xff]  ;;  %v271_v48 = vld [vmem:[#allocation2 + $0x130] sm:$0xff] }
  0x2c   :  { %1088 = vmatprep.subr.mxu0 %v1441_v1  ;;  %1123 = vmatprep.subr.mxu1 %v1441_v1  ;;  %v270_v49 = vld [vmem:[#allocation2 + $0x128] sm:$0xff]  ;;  %v269_v50 = vld [vmem:[#allocation2 + $0x120] sm:$0xff]  ;;  %v268_v58 = vld [vmem:[#allocation2 + $0x118] sm:$0xff] }
  0x2d   :  { %1089 = vmatpush3.msra.mxu0 %v64_v13  ;;  %1124 = vmatpush3.msra.mxu1 %v168_v18  ;;  %v917_v51 = vld [vmem:[%s1652_s2] ss:$0 sm:$0xff]  ;;  %v267_v59 = vld [vmem:[#allocation2 + $0x110] sm:$0xff]  ;;  %v266_v60 = vld [vmem:[#allocation2 + $0x108] sm:$0xff] }
  0x2e   :  { %1090 = vmatprep.subr.mxu0 %v1441_v1  ;;  %1125 = vmatprep.subr.mxu1 %v1441_v1  ;;  %v918_v53 = vld [vmem:[#allocation5] ss:$0 sm:$0xff]  ;;  %v386_v62 = vld [vmem:[#allocation2 + $0x1f8] sm:$0xff]  ;;  %v385_v63 = vld [vmem:[#allocation2 + $0x1f0] sm:$0xff] }
  0x2f   :  { %1091 = vmatpush3.msra.mxu0 %v63_v15  ;;  %1126 = vmatpush3.msra.mxu1 %v167_v20  ;;  %v265_v61 = vld [vmem:[#allocation2 + $0x100] sm:$0xff]  ;;  %v384_v0 = vld [vmem:[#allocation2 + $0x1e8] sm:$0xff]  ;;  %v382_v3 = vld [vmem:[#allocation2 + $0x1d8] sm:$0xff] }
  0x30   :  { %1092 = vmatprep.subr.mxu0 %v1441_v1  ;;  %1127 = vmatprep.subr.mxu1 %v1441_v1  ;;  %v383_v2 = vld [vmem:[#allocation2 + $0x1e0] sm:$0xff]  ;;  %v381_v4 = vld [vmem:[#allocation2 + $0x1d0] sm:$0xff]  ;;  %v380_v5 = vld [vmem:[#allocation2 + $0x1c8] sm:$0xff] }
  0x31   :  { %1093 = vmatpush3.msra.mxu0 %v62_v17  ;;  %1128 = vmatpush3.msra.mxu1 %v166_v22  ;;  %v379_v6 = vld [vmem:[#allocation2 + $0x1c0] sm:$0xff]  ;;  %v378_v7 = vld [vmem:[#allocation2 + $0x1b8] sm:$0xff]  ;;  %v377_v8 = vld [vmem:[#allocation2 + $0x1b0] sm:$0xff] }
  0x32   :  { %1094 = vmatprep.subr.mxu0 %v1441_v1  ;;  %1129 = vmatprep.subr.mxu1 %v1441_v1  ;;  %v376_v9 = vld [vmem:[#allocation2 + $0x1a8] sm:$0xff]  ;;  %v375_v10 = vld [vmem:[#allocation2 + $0x1a0] sm:$0xff]  ;;  %v374_v18 = vld [vmem:[#allocation2 + $0x198] sm:$0xff] }
  0x33   :  { %1095 = vmatpush3.msra.mxu0 %v61_v19  ;;  %1130 = vmatpush3.msra.mxu1 %v165_v24  ;;  %v920_v11 = vld [vmem:[%s1652_s2 + $0x1] ss:$0 sm:$0xff]  ;;  %v373_v19 = vld [vmem:[#allocation2 + $0x190] sm:$0xff]  ;;  %v372_v20 = vld [vmem:[#allocation2 + $0x188] sm:$0xff] }
  0x34   :  { %1096 = vmatprep.subr.mxu0 %v1441_v1  ;;  %1131 = vmatprep.subr.mxu1 %v1441_v1  ;;  %v921_v13 = vld [vmem:[#allocation5 + $0x1] ss:$0 sm:$0xff]  ;;  %v491_v22 = vld [vmem:[#allocation2 + $0x278] sm:$0xff]  ;;  %v489_v24 = vld [vmem:[#allocation2 + $0x268] sm:$0xff] }
  0x35   :  { %1097 = vmatpush3.msra.mxu0 %v60_v21  ;;  %1132 = vmatpush3.msra.mxu1 %v164_v26  ;;  %v371_v21 = vld [vmem:[#allocation2 + $0x180] sm:$0xff]  ;;  %v487_v26 = vld [vmem:[#allocation2 + $0x258] sm:$0xff]  ;;  %v482_v31 = vld [vmem:[#allocation2 + $0x230] sm:$0xff] }
  0x36   :  { %1098 = vmatprep.subr.mxu0 %v1441_v1  ;;  %1133 = vmatprep.subr.mxu1 %v1441_v1 }
  0x37   :  { %1099 = vmatpush3.msra.mxu0 %v59_v23  ;;  %1134 = vmatpush3.msra.mxu1 %v163_v28  ;;  %v490_v23 = vld [vmem:[#allocation2 + $0x270] sm:$0xff]  ;;  %v485_v28 = vld [vmem:[#allocation2 + $0x248] sm:$0xff] }
  0x38   :  { %1100 = vmatprep.subr.mxu0 %v1441_v1  ;;  %1135 = vmatprep.subr.mxu1 %v1441_v1 }
  0x39   :  { %1101 = vmatpush3.msra.mxu0 %v58_v25  ;;  %1136 = vmatpush3.msra.mxu1 %v162_v35  ;;  %v488_v25 = vld [vmem:[#allocation2 + $0x260] sm:$0xff] }
  0x3a   :  { %1102 = vmatprep.subr.mxu0 %v1441_v1  ;;  %1137 = vmatprep.subr.mxu1 %v1441_v1  ;;  %v923_v35 = vld [vmem:[%s1652_s2 + $0x2] ss:$0 sm:$0xff] }
  0x3b   :  { %1103 = vmatpush3.msra.mxu0 %v57_v27  ;;  %1138 = vmatpush3.msra.mxu1 %v161_v36  ;;  %v486_v27 = vld [vmem:[#allocation2 + $0x250] sm:$0xff] }
  0x3c   :  { %1104 = vmatprep.subr.mxu0 %v1441_v1  ;;  %1139 = vmatprep.subr.mxu1 %v1441_v1 }
  0x3d   :  { %1105 = vmatpush3.msra.mxu0 %v56_v29  ;;  %1140 = vmatpush3.msra.mxu1 %v160_v37  ;;  %v484_v29 = vld [vmem:[#allocation2 + $0x240] sm:$0xff] }
  0x3e   :  { %1106 = vmatprep.subr.mxu0 %v1441_v1  ;;  %1141 = vmatprep.subr.mxu1 %v1441_v1  ;;  %v924_v37 = vld [vmem:[#allocation5 + $0x2] ss:$0 sm:$0xff] }
  0x3f   :  { %1107 = vmatpush3.msra.mxu0 %v55_v30  ;;  %1142 = vmatpush3.msra.mxu1 %v159_v38  ;;  %v483_v30 = vld [vmem:[#allocation2 + $0x238] sm:$0xff] }
  0x40   :  { %1146 = vmatprep.subr.mxu0 %v1441_v1  ;;  %1181 = vmatprep.subr.mxu1 %v1441_v1 }
  0x9b   :  { %v51_v33 = vpop.permute.xlu0 %50 }
  0x9c   :  { %vm52_vm1 = vcmp.eq.s32.totalorder %v47_v32, %v51_v33  ;;  %v481_v32 = vld [vmem:[#allocation2 + $0x228] sm:$0xff]  ;;  %v480_v33 = vld [vmem:[#allocation2 + $0x220] sm:$0xff] }
  0x9d   :  { %1109 = vmatmul.mubr.msk.f32.vlgmr.msra.gmra.mxu0 %vm52_vm1, %v1443_v34  ;;  %v479_v34 = vld [vmem:[#allocation2 + $0x218] sm:$0xff] }
  0x9e   :  { %1178 = vmatprep.mubr.msk.f32.mxu0 %vm1442_vm0, %v1441_v1  ;;  %1147 = vmatpush3.msra.mxu0 %v280_v39 }
  0x9f   :  { %1148 = vmatprep.subr.mxu0 %v1441_v1 }
  0xa0   :  { %1149 = vmatpush3.msra.mxu0 %v279_v40 }
  0xa1   :  { %1150 = vmatprep.subr.mxu0 %v1441_v1 }
  0xa2   :  { %1151 = vmatpush3.msra.mxu0 %v278_v41 }
  0xa3   :  { %1152 = vmatprep.subr.mxu0 %v1441_v1 }
  0xa4   :  { %1153 = vmatpush3.msra.mxu0 %v277_v42  ;;  %v478_v42 = vld [vmem:[#allocation2 + $0x210] sm:$0xff] }
  0xa5   :  { %1154 = vmatprep.subr.mxu0 %v1441_v1 }
  0xa6   :  { %1155 = vmatpush3.msra.mxu0 %v276_v43  ;;  %v477_v43 = vld [vmem:[#allocation2 + $0x208] sm:$0xff] }
  0xa7   :  { %1156 = vmatprep.subr.mxu0 %v1441_v1 }
  0xa8   :  { %1157 = vmatpush3.msra.mxu0 %v275_v44  ;;  %v476_v44 = vld [vmem:[#allocation2 + $0x200] sm:$0xff] }
  0xa9   :  { %1158 = vmatprep.subr.mxu0 %v1441_v1 }
  0xaa   :  { %1159 = vmatpush3.msra.mxu0 %v274_v45  ;;  %v597_v45 = vld [vmem:[#allocation2 + $0x2f8] sm:$0xff] }
  0xab   :  { %1160 = vmatprep.subr.mxu0 %v1441_v1 }
  0xac   :  { %1161 = vmatpush3.msra.mxu0 %v273_v46  ;;  %v596_v46 = vld [vmem:[#allocation2 + $0x2f0] sm:$0xff] }
  0xad   :  { %1162 = vmatprep.subr.mxu0 %v1441_v1 }
  0xae   :  { %1163 = vmatpush3.msra.mxu0 %v272_v47  ;;  %v595_v47 = vld [vmem:[#allocation2 + $0x2e8] sm:$0xff] }
  0xaf   :  { %1164 = vmatprep.subr.mxu0 %v1441_v1 }
  0xb0   :  { %1165 = vmatpush3.msra.mxu0 %v271_v48  ;;  %v594_v48 = vld [vmem:[#allocation2 + $0x2e0] sm:$0xff] }
  0xb1   :  { %1166 = vmatprep.subr.mxu0 %v1441_v1 }
  0xb2   :  { %1167 = vmatpush3.msra.mxu0 %v270_v49  ;;  %v593_v49 = vld [vmem:[#allocation2 + $0x2d8] sm:$0xff] }
  0xb3   :  { %1168 = vmatprep.subr.mxu0 %v1441_v1 }
  0xb4   :  { %1169 = vmatpush3.msra.mxu0 %v269_v50  ;;  %v592_v50 = vld [vmem:[#allocation2 + $0x2d0] sm:$0xff] }
  0xb5   :  { %1170 = vmatprep.subr.mxu0 %v1441_v1 }
  0xb6   :  { %1171 = vmatpush3.msra.mxu0 %v268_v58 }
  0xb7   :  { %1172 = vmatprep.subr.mxu0 %v1441_v1 }
  0xb8   :  { %1173 = vmatpush3.msra.mxu0 %v267_v59  ;;  %v927_v59 = vld [vmem:[#allocation5 + $0x3] ss:$0 sm:$0xff] }
  0xb9   :  { %1174 = vmatprep.subr.mxu0 %v1441_v1 }
  0xba   :  { %1175 = vmatpush3.msra.mxu0 %v266_v60 }
  0xbb   :  { %1176 = vmatprep.subr.mxu0 %v1441_v1 }
  0xbc   :  { %1177 = vmatpush3.msra.mxu0 %v265_v61 }
  0xbd   :  { %1216 = vmatprep.subr.mxu0 %v1441_v1 }
 0x15d   :  { %v137_v52 = vpop.f32.mrf.mxu0 }
 0x15e   :  { %v148_v54 = vmul.f32 %v917_v51, %v137_v52  ;;  %v591_v51 = vld [vmem:[#allocation2 + $0x2c8] sm:$0xff]  ;;  %v590_v52 = vld [vmem:[#allocation2 + $0x2c0] sm:$0xff] }
 0x15f   :  { %v1110_v55 = vpop.f32.mrf.mxu0 }
 0x160   :  { %v156_v56 = vadd.f32 %v918_v53, %v148_v54  ;;  %v589_v53 = vld [vmem:[#allocation2 + $0x2b8] sm:$0xff]  ;;  %v588_v54 = vld [vmem:[#allocation2 + $0x2b0] sm:$0xff]  ;;  %v587_v55 = vld [vmem:[#allocation2 + $0x2a8] sm:$0xff] }
 0x162   :  { %v157_v57 = vmax.f32 %v156_v56, 0.0  ;;  %v586_v56 = vld [vmem:[#allocation2 + $0x2a0] sm:$0xff] }
 0x164   :  { %1144 = vmatmul.mubr.f32.vlgmr.msra.gmra.mxu1 %v157_v57  ;;  %v926_v57 = vld [vmem:[%s1652_s2 + $0x3] ss:$0 sm:$0xff] }
 0x165   :  { %1213 = vmatprep.mubr.msk.f32.mxu1 %vm1442_vm0, %v1441_v1  ;;  %1182 = vmatpush3.msra.mxu1 %v386_v62 }
 0x166   :  { %1183 = vmatprep.subr.mxu1 %v1441_v1 }
 0x167   :  { %1184 = vmatpush3.msra.mxu1 %v385_v63  ;;  %v585_v63 = vld [vmem:[#allocation2 + $0x298] sm:$0xff] }
 0x168   :  { %1185 = vmatprep.subr.mxu1 %v1441_v1 }
 0x169   :  { %1186 = vmatpush3.msra.mxu1 %v384_v0  ;;  %v584_v0 = vld [vmem:[#allocation2 + $0x290] sm:$0xff] }
 0x16a   :  { %1187 = vmatprep.subr.mxu1 %v1441_v1 }
 0x16b   :  { %1188 = vmatpush3.msra.mxu1 %v383_v2  ;;  %v583_v2 = vld [vmem:[#allocation2 + $0x288] sm:$0xff] }
 0x16c   :  { %1189 = vmatprep.subr.mxu1 %v1441_v1 }
 0x16d   :  { %1190 = vmatpush3.msra.mxu1 %v382_v3  ;;  %v582_v3 = vld [vmem:[#allocation2 + $0x280] sm:$0xff] }
 0x16e   :  { %1191 = vmatprep.subr.mxu1 %v1441_v1 }
 0x16f   :  { %1192 = vmatpush3.msra.mxu1 %v381_v4  ;;  %v703_v4 = vld [vmem:[#allocation2 + $0x378] sm:$0xff] }
 0x170   :  { %1193 = vmatprep.subr.mxu1 %v1441_v1 }
 0x171   :  { %1194 = vmatpush3.msra.mxu1 %v380_v5  ;;  %v702_v5 = vld [vmem:[#allocation2 + $0x370] sm:$0xff] }
 0x172   :  { %1195 = vmatprep.subr.mxu1 %v1441_v1 }
 0x173   :  { %1196 = vmatpush3.msra.mxu1 %v379_v6  ;;  %v701_v6 = vld [vmem:[#allocation2 + $0x368] sm:$0xff] }
 0x174   :  { %1197 = vmatprep.subr.mxu1 %v1441_v1 }
 0x175   :  { %1198 = vmatpush3.msra.mxu1 %v378_v7  ;;  %v700_v7 = vld [vmem:[#allocation2 + $0x360] sm:$0xff] }
 0x176   :  { %1199 = vmatprep.subr.mxu1 %v1441_v1 }
 0x177   :  { %1200 = vmatpush3.msra.mxu1 %v377_v8  ;;  %v699_v8 = vld [vmem:[#allocation2 + $0x358] sm:$0xff] }
 0x178   :  { %1201 = vmatprep.subr.mxu1 %v1441_v1 }
 0x179   :  { %1202 = vmatpush3.msra.mxu1 %v376_v9  ;;  %v698_v9 = vld [vmem:[#allocation2 + $0x350] sm:$0xff] }
 0x17a   :  { %1203 = vmatprep.subr.mxu1 %v1441_v1 }
 0x17b   :  { %1204 = vmatpush3.msra.mxu1 %v375_v10  ;;  %v697_v10 = vld [vmem:[#allocation2 + $0x348] sm:$0xff] }
 0x17c   :  { %1205 = vmatprep.subr.mxu1 %v1441_v1 }
 0x17d   :  { %1206 = vmatpush3.msra.mxu1 %v374_v18  ;;  %v930_v18 = vld [vmem:[#allocation5 + $0x4] ss:$0 sm:$0xff] }
 0x17e   :  { %1207 = vmatprep.subr.mxu1 %v1441_v1 }
 0x17f   :  { %1208 = vmatpush3.msra.mxu1 %v373_v19 }
 0x180   :  { %1209 = vmatprep.subr.mxu1 %v1441_v1 }
 0x181   :  { %1210 = vmatpush3.msra.mxu1 %v372_v20 }
 0x182   :  { %1211 = vmatprep.subr.mxu1 %v1441_v1 }
 0x183   :  { %1212 = vmatpush3.msra.mxu1 %v371_v21 }
 0x184   :  { %1251 = vmatprep.subr.mxu1 %v1441_v1 }
 0x224   :  { %v241_v12 = vpop.f32.mrf.mxu1 }
 0x225   :  { %v253_v14 = vmul.f32 %v920_v11, %v241_v12  ;;  %v696_v11 = vld [vmem:[#allocation2 + $0x340] sm:$0xff]  ;;  %v695_v12 = vld [vmem:[#allocation2 + $0x338] sm:$0xff] }
 0x226   :  { %v1145_v15 = vpop.f32.mrf.mxu1 }
 0x227   :  { %v262_v16 = vadd.f32 %v921_v13, %v253_v14  ;;  %v694_v13 = vld [vmem:[#allocation2 + $0x330] sm:$0xff]  ;;  %v693_v14 = vld [vmem:[#allocation2 + $0x328] sm:$0xff]  ;;  %v692_v15 = vld [vmem:[#allocation2 + $0x320] sm:$0xff] }
 0x229   :  { %v263_v17 = vmax.f32 %v262_v16, 0.0  ;;  %v929_v16 = vld [vmem:[%s1652_s2 + $0x4] ss:$0 sm:$0xff] }
 0x22b   :  { %1179 = vmatmul.mubr.f32.vlgmr.msra.gmra.mxu0 %v263_v17 }
 0x22c   :  { %1248 = vmatprep.mubr.msk.f32.mxu0 %vm1442_vm0, %v1441_v1  ;;  %1217 = vmatpush3.msra.mxu0 %v491_v22 }
 0x22d   :  { %1218 = vmatprep.subr.mxu0 %v1441_v1 }
 0x22e   :  { %1219 = vmatpush3.msra.mxu0 %v490_v23  ;;  %v691_v23 = vld [vmem:[#allocation2 + $0x318] sm:$0xff] }
 0x22f   :  { %1220 = vmatprep.subr.mxu0 %v1441_v1 }
 0x230   :  { %1221 = vmatpush3.msra.mxu0 %v489_v24  ;;  %v690_v24 = vld [vmem:[#allocation2 + $0x310] sm:$0xff] }
 0x231   :  { %1222 = vmatprep.subr.mxu0 %v1441_v1 }
 0x232   :  { %1223 = vmatpush3.msra.mxu0 %v488_v25  ;;  %v689_v25 = vld [vmem:[#allocation2 + $0x308] sm:$0xff] }
 0x233   :  { %1224 = vmatprep.subr.mxu0 %v1441_v1 }
 0x234   :  { %1225 = vmatpush3.msra.mxu0 %v487_v26  ;;  %v688_v26 = vld [vmem:[#allocation2 + $0x300] sm:$0xff] }
 0x235   :  { %1226 = vmatprep.subr.mxu0 %v1441_v1 }
 0x236   :  { %1227 = vmatpush3.msra.mxu0 %v486_v27  ;;  %v809_v27 = vld [vmem:[#allocation2 + $0x3f8] sm:$0xff] }
 0x237   :  { %1228 = vmatprep.subr.mxu0 %v1441_v1 }
 0x238   :  { %1229 = vmatpush3.msra.mxu0 %v485_v28  ;;  %v808_v28 = vld [vmem:[#allocation2 + $0x3f0] sm:$0xff] }
 0x239   :  { %1230 = vmatprep.subr.mxu0 %v1441_v1 }
 0x23a   :  { %1231 = vmatpush3.msra.mxu0 %v484_v29  ;;  %v807_v29 = vld [vmem:[#allocation2 + $0x3e8] sm:$0xff] }
 0x23b   :  { %1232 = vmatprep.subr.mxu0 %v1441_v1 }
 0x23c   :  { %1233 = vmatpush3.msra.mxu0 %v483_v30  ;;  %v806_v30 = vld [vmem:[#allocation2 + $0x3e0] sm:$0xff] }
 0x23d   :  { %1234 = vmatprep.subr.mxu0 %v1441_v1 }
 0x23e   :  { %1235 = vmatpush3.msra.mxu0 %v482_v31  ;;  %v805_v31 = vld [vmem:[#allocation2 + $0x3d8] sm:$0xff] }
 0x23f   :  { %1236 = vmatprep.subr.mxu0 %v1441_v1 }
 0x240   :  { %1237 = vmatpush3.msra.mxu0 %v481_v32  ;;  %v804_v32 = vld [vmem:[#allocation2 + $0x3d0] sm:$0xff] }
 0x241   :  { %1238 = vmatprep.subr.mxu0 %v1441_v1 }
 0x242   :  { %1239 = vmatpush3.msra.mxu0 %v480_v33  ;;  %v803_v33 = vld [vmem:[#allocation2 + $0x3c8] sm:$0xff] }
 0x243   :  { %1240 = vmatprep.subr.mxu0 %v1441_v1 }
 0x244   :  { %1241 = vmatpush3.msra.mxu0 %v479_v34  ;;  %v802_v34 = vld [vmem:[#allocation2 + $0x3c0] sm:$0xff] }
 0x245   :  { %1242 = vmatprep.subr.mxu0 %v1441_v1 }
 0x246   :  { %1243 = vmatpush3.msra.mxu0 %v478_v42 }
 0x247   :  { %1244 = vmatprep.subr.mxu0 %v1441_v1 }
 0x248   :  { %1245 = vmatpush3.msra.mxu0 %v477_v43 }
 0x249   :  { %1246 = vmatprep.subr.mxu0 %v1441_v1 }
 0x24a   :  { %1247 = vmatpush3.msra.mxu0 %v476_v44 }
 0x24b   :  { %1286 = vmatprep.subr.mxu0 %v1441_v1 }
 0x2eb   :  { %v347_v36 = vpop.f32.mrf.mxu0 }
 0x2ec   :  { %v359_v38 = vmul.f32 %v923_v35, %v347_v36  ;;  %v801_v35 = vld [vmem:[#allocation2 + $0x3b8] sm:$0xff]  ;;  %v800_v36 = vld [vmem:[#allocation2 + $0x3b0] sm:$0xff] }
 0x2ed   :  { %v1180_v39 = vpop.f32.mrf.mxu0 }
 0x2ee   :  { %v368_v40 = vadd.f32 %v924_v37, %v359_v38  ;;  %v799_v37 = vld [vmem:[#allocation2 + $0x3a8] sm:$0xff]  ;;  %v798_v38 = vld [vmem:[#allocation2 + $0x3a0] sm:$0xff] }
 0x2ef   :  { %v932_v39 = vld [vmem:[%s1652_s2 + $0x5] ss:$0 sm:$0xff] }
 0x2f0   :  { %v369_v41 = vmax.f32 %v368_v40, 0.0 }
 0x2f2   :  { %1214 = vmatmul.mubr.f32.vlgmr.msra.gmra.mxu1 %v369_v41  ;;  %v933_v41 = vld [vmem:[#allocation5 + $0x5] ss:$0 sm:$0xff] }
 0x2f3   :  { %1283 = vmatprep.mubr.msk.f32.mxu1 %vm1442_vm0, %v1441_v1  ;;  %1252 = vmatpush3.msra.mxu1 %v597_v45 }
 0x2f4   :  { %1253 = vmatprep.subr.mxu1 %v1441_v1 }
 0x2f5   :  { %1254 = vmatpush3.msra.mxu1 %v596_v46  ;;  %v797_v46 = vld [vmem:[#allocation2 + $0x398] sm:$0xff] }
 0x2f6   :  { %1255 = vmatprep.subr.mxu1 %v1441_v1 }
 0x2f7   :  { %1256 = vmatpush3.msra.mxu1 %v595_v47  ;;  %v796_v47 = vld [vmem:[#allocation2 + $0x390] sm:$0xff] }
 0x2f8   :  { %1257 = vmatprep.subr.mxu1 %v1441_v1 }
 0x2f9   :  { %1258 = vmatpush3.msra.mxu1 %v594_v48  ;;  %v795_v48 = vld [vmem:[#allocation2 + $0x388] sm:$0xff] }
 0x2fa   :  { %1259 = vmatprep.subr.mxu1 %v1441_v1 }
 0x2fb   :  { %1260 = vmatpush3.msra.mxu1 %v593_v49  ;;  %v794_v49 = vld [vmem:[#allocation2 + $0x380] sm:$0xff] }
 0x2fc   :  { %1261 = vmatprep.subr.mxu1 %v1441_v1 }
 0x2fd   :  { %1262 = vmatpush3.msra.mxu1 %v592_v50  ;;  %v935_v50 = vld [vmem:[%s1652_s2 + $0x6] ss:$0 sm:$0xff] }
 0x2fe   :  { %1263 = vmatprep.subr.mxu1 %v1441_v1 }
 0x2ff   :  { %1264 = vmatpush3.msra.mxu1 %v591_v51 }
 0x300   :  { %1265 = vmatprep.subr.mxu1 %v1441_v1 }
 0x301   :  { %1266 = vmatpush3.msra.mxu1 %v590_v52  ;;  %v936_v52 = vld [vmem:[#allocation5 + $0x6] ss:$0 sm:$0xff] }
 0x302   :  { %1267 = vmatprep.subr.mxu1 %v1441_v1 }
 0x303   :  { %1268 = vmatpush3.msra.mxu1 %v589_v53 }
 0x304   :  { %1269 = vmatprep.subr.mxu1 %v1441_v1 }
 0x305   :  { %1270 = vmatpush3.msra.mxu1 %v588_v54 }
 0x306   :  { %1271 = vmatprep.subr.mxu1 %v1441_v1 }
 0x307   :  { %1272 = vmatpush3.msra.mxu1 %v587_v55 }
 0x308   :  { %1273 = vmatprep.subr.mxu1 %v1441_v1 }
 0x309   :  { %1274 = vmatpush3.msra.mxu1 %v586_v56 }
 0x30a   :  { %1275 = vmatprep.subr.mxu1 %v1441_v1 }
 0x30b   :  { %1276 = vmatpush3.msra.mxu1 %v585_v63 }
 0x30c   :  { %1277 = vmatprep.subr.mxu1 %v1441_v1 }
 0x30d   :  { %1278 = vmatpush3.msra.mxu1 %v584_v0 }
 0x30e   :  { %1279 = vmatprep.subr.mxu1 %v1441_v1 }
 0x30f   :  { %1280 = vmatpush3.msra.mxu1 %v583_v2 }
 0x310   :  { %1281 = vmatprep.subr.mxu1 %v1441_v1 }
 0x311   :  { %1282 = vmatpush3.msra.mxu1 %v582_v3 }
 0x312   :  { %1321 = vmatprep.subr.mxu1 %v1441_v1 }
 0x3b2   :  { %v453_v58 = vpop.f32.mrf.mxu1 }
 0x3b3   :  { %v465_v60 = vmul.f32 %v926_v57, %v453_v58  ;;  %v938_v57 = vld [vmem:[%s1652_s2 + $0x7] ss:$0 sm:$0xff] }
 0x3b4   :  { %v1215_v61 = vpop.f32.mrf.mxu1 }
 0x3b5   :  { %v474_v62 = vadd.f32 %v927_v59, %v465_v60  ;;  %v939_v59 = vld [vmem:[#allocation5 + $0x7] ss:$0 sm:$0xff] }
 0x3b7   :  { %1249 = vmatmul.mubr.f32.vlgmr.msra.gmra.mxu0 %v474_v62 }
 0x3b8   :  { %1318 = vmatprep.mubr.msk.f32.mxu0 %vm1442_vm0, %v1441_v1  ;;  %1287 = vmatpush3.msra.mxu0 %v703_v4 }
 0x3b9   :  { %1288 = vmatprep.subr.mxu0 %v1441_v1 }
 0x3ba   :  { %1289 = vmatpush3.msra.mxu0 %v702_v5 }
 0x3bb   :  { %1290 = vmatprep.subr.mxu0 %v1441_v1 }
 0x3bc   :  { %1291 = vmatpush3.msra.mxu0 %v701_v6 }
 0x3bd   :  { %1292 = vmatprep.subr.mxu0 %v1441_v1 }
 0x3be   :  { %1293 = vmatpush3.msra.mxu0 %v700_v7 }
 0x3bf   :  { %1294 = vmatprep.subr.mxu0 %v1441_v1 }
 0x3c0   :  { %1295 = vmatpush3.msra.mxu0 %v699_v8 }
 0x3c1   :  { %1296 = vmatprep.subr.mxu0 %v1441_v1 }
 0x3c2   :  { %1297 = vmatpush3.msra.mxu0 %v698_v9 }
 0x3c3   :  { %1298 = vmatprep.subr.mxu0 %v1441_v1 }
 0x3c4   :  { %1299 = vmatpush3.msra.mxu0 %v697_v10 }
 0x3c5   :  { %1300 = vmatprep.subr.mxu0 %v1441_v1 }
 0x3c6   :  { %1301 = vmatpush3.msra.mxu0 %v696_v11 }
 0x3c7   :  { %1302 = vmatprep.subr.mxu0 %v1441_v1 }
 0x3c8   :  { %1303 = vmatpush3.msra.mxu0 %v695_v12 }
 0x3c9   :  { %1304 = vmatprep.subr.mxu0 %v1441_v1 }
 0x3ca   :  { %1305 = vmatpush3.msra.mxu0 %v694_v13 }
 0x3cb   :  { %1306 = vmatprep.subr.mxu0 %v1441_v1 }
 0x3cc   :  { %1307 = vmatpush3.msra.mxu0 %v693_v14 }
 0x3cd   :  { %1308 = vmatprep.subr.mxu0 %v1441_v1 }
 0x3ce   :  { %1309 = vmatpush3.msra.mxu0 %v692_v15 }
 0x3cf   :  { %1310 = vmatprep.subr.mxu0 %v1441_v1 }
 0x3d0   :  { %1311 = vmatpush3.msra.mxu0 %v691_v23 }
 0x3d1   :  { %1312 = vmatprep.subr.mxu0 %v1441_v1 }
 0x3d2   :  { %1313 = vmatpush3.msra.mxu0 %v690_v24 }
 0x3d3   :  { %1314 = vmatprep.subr.mxu0 %v1441_v1 }
 0x3d4   :  { %1315 = vmatpush3.msra.mxu0 %v689_v25 }
 0x3d5   :  { %1316 = vmatprep.subr.mxu0 %v1441_v1 }
 0x3d6   :  { %1317 = vmatpush3.msra.mxu0 %v688_v26 }
 0x477   :  { %v558_v17 = vpop.f32.mrf.mxu0 }
 0x478   :  { %v570_v19 = vmul.f32 %v929_v16, %v558_v17 }
 0x479   :  { %v1250_v20 = vpop.f32.mrf.mxu0 }
 0x47a   :  { %v579_v21 = vadd.f32 %v930_v18, %v570_v19 }
 0x47c   :  { %v580_v22 = vmax.f32 %v579_v21, 0.0 }
 0x47e   :  { %1284 = vmatmul.mubr.f32.vlgmr.msra.gmra.mxu1 %v580_v22 }
 0x47f   :  { %1353 = vmatprep.mubr.msk.f32.mxu1 %vm1442_vm0, %v1441_v1  ;;  %1322 = vmatpush3.msra.mxu1 %v809_v27 }
 0x480   :  { %1323 = vmatprep.subr.mxu1 %v1441_v1 }
 0x481   :  { %1324 = vmatpush3.msra.mxu1 %v808_v28 }
 0x482   :  { %1325 = vmatprep.subr.mxu1 %v1441_v1 }
 0x483   :  { %1326 = vmatpush3.msra.mxu1 %v807_v29 }
 0x484   :  { %1327 = vmatprep.subr.mxu1 %v1441_v1 }
 0x485   :  { %1328 = vmatpush3.msra.mxu1 %v806_v30 }
 0x486   :  { %1329 = vmatprep.subr.mxu1 %v1441_v1 }
 0x487   :  { %1330 = vmatpush3.msra.mxu1 %v805_v31 }
 0x488   :  { %1331 = vmatprep.subr.mxu1 %v1441_v1 }
 0x489   :  { %1332 = vmatpush3.msra.mxu1 %v804_v32 }
 0x48a   :  { %1333 = vmatprep.subr.mxu1 %v1441_v1 }
 0x48b   :  { %1334 = vmatpush3.msra.mxu1 %v803_v33 }
 0x48c   :  { %1335 = vmatprep.subr.mxu1 %v1441_v1 }
 0x48d   :  { %1336 = vmatpush3.msra.mxu1 %v802_v34 }
 0x48e   :  { %1337 = vmatprep.subr.mxu1 %v1441_v1 }
 0x48f   :  { %1338 = vmatpush3.msra.mxu1 %v801_v35 }
 0x490   :  { %1339 = vmatprep.subr.mxu1 %v1441_v1 }
 0x491   :  { %1340 = vmatpush3.msra.mxu1 %v800_v36 }
 0x492   :  { %1341 = vmatprep.subr.mxu1 %v1441_v1 }
 0x493   :  { %1342 = vmatpush3.msra.mxu1 %v799_v37 }
 0x494   :  { %1343 = vmatprep.subr.mxu1 %v1441_v1 }
 0x495   :  { %1344 = vmatpush3.msra.mxu1 %v798_v38 }
 0x496   :  { %1345 = vmatprep.subr.mxu1 %v1441_v1 }
 0x497   :  { %1346 = vmatpush3.msra.mxu1 %v797_v46 }
 0x498   :  { %1347 = vmatprep.subr.mxu1 %v1441_v1 }
 0x499   :  { %1348 = vmatpush3.msra.mxu1 %v796_v47 }
 0x49a   :  { %1349 = vmatprep.subr.mxu1 %v1441_v1 }
 0x49b   :  { %1350 = vmatpush3.msra.mxu1 %v795_v48 }
 0x49c   :  { %1351 = vmatprep.subr.mxu1 %v1441_v1 }
 0x49d   :  { %1352 = vmatpush3.msra.mxu1 %v794_v49 }
 0x53e   :  { %v664_v40 = vpop.f32.mrf.mxu1 }
 0x53f   :  { %v676_v42 = vmul.f32 %v932_v39, %v664_v40 }
 0x540   :  { %v1285_v43 = vpop.f32.mrf.mxu1 }
 0x541   :  { %v685_v44 = vadd.f32 %v933_v41, %v676_v42 }
 0x543   :  { %v686_v45 = vmax.f32 %v685_v44, 0.0 }
 0x545   :  { %1319 = vmatmul.mubr.f32.vlgmr.msra.gmra.mxu0 %v686_v45 }
 0x605   :  { %v770_v51 = vpop.f32.mrf.mxu0 }
 0x606   :  { %v782_v53 = vmul.f32 %v935_v50, %v770_v51 }
 0x607   :  { %v1320_v54 = vpop.f32.mrf.mxu0 }
 0x608   :  { %v791_v55 = vadd.f32 %v936_v52, %v782_v53 }
 0x60a   :  { %v792_v56 = vmax.f32 %v791_v55, 0.0 }
 0x60c   :  { %1354 = vmatmul.mubr.f32.vlgmr.msra.gmra.mxu1 %v792_v56 }
 0x6cc   :  { %v876_v58 = vpop.f32.mrf.mxu1 }
 0x6cd   :  { %v888_v1 = vmul.f32 %v938_v57, %v876_v58 }
 0x6ce   :  { %v1355_v60 = vpop.f32.mrf.mxu1 }
 0x6cf   :  { %v897_v61 = vadd.f32 %v939_v59, %v888_v1 }
 0x6d1   :  { %898 = vst [vmem:[#allocation7] sm:$0xff] %v897_v61 }
 0x6d2   :  { %1419 = shalt.err (!%p1416_p0)
}
 0x6d3   :  { %908 = dma.vmem_to_hbm [thread:$0]  %s906_s19, 128, %s1654_s4, [#allocation4]  }
 0x6d4   :  { %1432 = dma.done.wait [#allocation4], 128  }
 0x6d5   :  { %1433 = vsyncadd [#allocation4], 4294967168 }
 0x6d6   :  { %912 = vsyncpa [#allocation3], 1 }
 0x6d7   :  { %913 = vsyncpa [#allocation6], 1 }
 0x6d8   :  { %914 = vsyncpa [#allocation4], 1 }

</bundles_post_ra>
